<compile_context>
chip_gen: v7x
topology: tpu7x:2x2x1
jax: 0.10.0
libtpu: 0.0.40
codegen_flags: <defaults>
</compile_context>

<pallas_src>
import jax
import jax.numpy as jnp
from jax.experimental import pallas as pl

EPS = 1e-5

# Above this many bytes for the full (B, S, D) input, switch to the CLS-only
# squeezed BlockSpec instead of DMA-ing the whole block.
_WHOLE_BLOCK_BYTES_LIMIT = 2 << 20  # 2 MiB


def _age_regressor_kernel(x_ref, w_ref, o_ref):
    # x_ref: (B, D) or (B, S, D)  — rank-3 means the whole block was DMA'd
    #                               and we take the CLS row here.
    # w_ref: (D+1, O) augmented weight; rows [:D] = gamma[:,None] * W^T,
    #                               row  [D]  = beta @ W^T + bias.
    # o_ref: (B, O)
    x = x_ref[...]
    if x.ndim == 3:
        x = x[:, 0, :]                       # CLS token (in-kernel slice)
    x = x.astype(jnp.float32)

    # Training-mode BatchNorm1d stats, fused single pass:
    #   mean = E[x], var = E[x^2] - mean^2  (biased batch variance).
    inv_b = 1.0 / x.shape[0]
    s1 = jnp.sum(x, axis=0, keepdims=True)            # (1, D)
    s2 = jnp.sum(x * x, axis=0, keepdims=True)        # (1, D)
    mean = s1 * inv_b
    var = s2 * inv_b - mean * mean
    inv_std = jax.lax.rsqrt(var + EPS)                 # EUP slot (free)
    x_hat = (x - mean) * inv_std                       # (B, D)

    # gamma/beta/bias already folded into w_ref — straight to the MXU.
    d = w_ref.shape[0] - 1
    w = w_ref[...]                                     # (D+1, O)
    out = jnp.dot(x_hat, w[:d, :], preferred_element_type=jnp.float32)
    o_ref[...] = (out + w[d:d + 1, :]).astype(o_ref.dtype)


def fold_params(gamma, beta, weight, bias):
    """Fold BN affine + Linear into one augmented weight.  Call ONCE at init.

    Args:
      gamma:  (D,)   BatchNorm1d weight.
      beta:   (D,)   BatchNorm1d bias.
      weight: (O, D) Linear weight (PyTorch layout).
      bias:   (O,)   Linear bias.

    Returns:
      (D+1, O) float32:  rows [:D] = gamma[:,None] * W^T,
                         row  [D]  = beta @ W^T + bias.
    """
    w_t = jnp.transpose(weight).astype(jnp.float32)                  # (D, O)
    w_fold = gamma.astype(jnp.float32)[:, None] * w_t                # (D, O)
    b_fold = beta.astype(jnp.float32) @ w_t + bias.astype(jnp.float32)  # (O,)
    return jnp.concatenate([w_fold, b_fold[None, :]], axis=0)        # (D+1, O)


def age_regressor_forward(x, w_aug):
    """Forward pass of AgeRegressor using pre-folded parameters.

    Args:
      x:     (B, D) or (B, S, D) — for rank-3 inputs only the CLS token
             x[:, 0] contributes to the output.
      w_aug: (D+1, O) augmented weight from `fold_params` (computed once,
             outside the per-call hot path).

    Returns:
      (B, O) float32 output.
    """
    d_plus_1, out_dim = w_aug.shape
    d = d_plus_1 - 1
    b = x.shape[0]

    if x.ndim > 2:
        s = x.shape[1]
        x_bytes_full = b * s * d * x.dtype.itemsize
        if x_bytes_full <= _WHOLE_BLOCK_BYTES_LIMIT:
            # Small S: one contiguous DMA of the whole block, slice in-kernel.
            x_spec = pl.BlockSpec((b, s, d), lambda: (0, 0, 0))
            x_bytes = x_bytes_full
        else:
            # Large S: CLS-only strided gather via squeezed seq dim.
            # TODO(synk): verify the size-1 second-minor block lowers on the
            # v5e Mosaic path; if rejected, fall back to the whole-block DMA.
            x_spec = pl.BlockSpec((b, None, d), lambda: (0, 0, 0))
            x_bytes = b * d * x.dtype.itemsize
    else:
        x_spec = pl.BlockSpec((b, d), lambda: (0, 0))
        x_bytes = b * d * x.dtype.itemsize

    cost = pl.CostEstimate(
        flops=2 * b * d * out_dim,
        transcendentals=0,
        bytes_accessed=x_bytes + d_plus_1 * out_dim * 4 + b * out_dim * 4,
    )

    return pl.pallas_call(
        _age_regressor_kernel,
        out_shape=jax.ShapeDtypeStruct((b, out_dim), jnp.float32),
        in_specs=[
            x_spec,
            pl.BlockSpec((d_plus_1, out_dim), lambda: (0, 0)),
        ],
        out_specs=pl.BlockSpec((b, out_dim), lambda: (0, 0)),
        cost_estimate=cost,
    )(x, w_aug)


def _reference_forward(x, gamma, beta, weight, bias):
    """Pure-JAX reference mirroring the PyTorch module (training-mode BN)."""
    if x.ndim > 2:
        x = x[:, 0]
    x = x.astype(jnp.float32)
    mean = jnp.mean(x, axis=0, keepdims=True)
    var = jnp.mean((x - mean) ** 2, axis=0, keepdims=True)
    x_hat = (x - mean) / jnp.sqrt(var + EPS)
    y = x_hat * gamma[None, :] + beta[None, :]
    return y @ weight.T + bias[None, :]


if __name__ == "__main__":
    key = jax.random.PRNGKey(0)
    k_x, k_g, k_b, k_w, k_bias = jax.random.split(key, 5)

    batch = 16
    seq = 8
    input_dim = 32
    output_dim = 4

    # Input: token sequence (batch, seq, input_dim) — forward reads x[:, 0].
    x = jax.random.normal(k_x, (batch, seq, input_dim), dtype=jnp.float32)

    # Deterministic synthetic parameters.
    gamma = 1.0 + 0.1 * jax.random.normal(k_g, (input_dim,), dtype=jnp.float32)
    beta = 0.1 * jax.random.normal(k_b, (input_dim,), dtype=jnp.float32)
    bound = 1.0 / jnp.sqrt(input_dim)
    weight = jax.random.uniform(
        k_w, (output_dim, input_dim), minval=-bound, maxval=bound, dtype=jnp.float32
    )
    bias = jax.random.uniform(
        k_bias, (output_dim,), minval=-bound, maxval=bound, dtype=jnp.float32
    )

    # Fold parameters ONCE (init-time), outside the per-call hot path.
    w_aug = jax.block_until_ready(fold_params(gamma, beta, weight, bias))

    fwd = jax.jit(age_regressor_forward)
    out = jax.block_until_ready(fwd(x, w_aug))

    ref = _reference_forward(x, gamma, beta, weight, bias)
    assert out.shape == (batch, output_dim)
    assert jnp.allclose(out, ref, atol=1e-4, rtol=1e-4), "mismatch vs reference"

    print("KERNEL_OK")
</pallas_src>

<mosaic_0001>
module attributes {stable_mosaic.version = 11 : i64} {
  func.func @_age_regressor_kernel(%arg0: memref<16x8x32xf32, #tpu.memory_space<vmem>>, %arg1: memref<33x4xf32, #tpu.memory_space<vmem>>, %arg2: memref<16x4xf32, #tpu.memory_space<vmem>>) attributes {dimension_semantics = [], scalar_prefetch = 0 : i64, scratch_operands = 0 : i64, tpu.core_type = #tpu.core_type<tc>} {
    %c0 = arith.constant 0 : index
    %c0_0 = arith.constant 0 : index
    %c0_1 = arith.constant 0 : index
    %0 = vector.load %arg0[%c0, %c0_0, %c0_1] : memref<16x8x32xf32, #tpu.memory_space<vmem>>, vector<16x8x32xf32>
    %1 = vector.extract_strided_slice %0 {offsets = [0, 0, 0], sizes = [16, 1, 32], strides = [1, 1, 1]} : vector<16x8x32xf32> to vector<16x1x32xf32>
    %2 = vector.shape_cast %1 : vector<16x1x32xf32> to vector<16x32xf32>
    %cst = arith.constant dense<0.000000e+00> : vector<32xf32>
    %3 = vector.multi_reduction <add>, %2, %cst [0] : vector<16x32xf32> to vector<32xf32>
    %4 = vector.shape_cast %3 : vector<32xf32> to vector<1x32xf32>
    %5 = arith.mulf %2, %2 : vector<16x32xf32>
    %cst_2 = arith.constant dense<0.000000e+00> : vector<32xf32>
    %6 = vector.multi_reduction <add>, %5, %cst_2 [0] : vector<16x32xf32> to vector<32xf32>
    %7 = vector.shape_cast %6 : vector<32xf32> to vector<1x32xf32>
    %cst_3 = arith.constant 6.250000e-02 : f32
    %8 = vector.broadcast %cst_3 : f32 to vector<1x32xf32>
    %9 = arith.mulf %4, %8 : vector<1x32xf32>
    %cst_4 = arith.constant 6.250000e-02 : f32
    %10 = vector.broadcast %cst_4 : f32 to vector<1x32xf32>
    %11 = arith.mulf %7, %10 : vector<1x32xf32>
    %12 = arith.mulf %9, %9 : vector<1x32xf32>
    %13 = arith.subf %11, %12 : vector<1x32xf32>
    %cst_5 = arith.constant 9.99999974E-6 : f32
    %14 = vector.broadcast %cst_5 : f32 to vector<1x32xf32>
    %15 = arith.addf %13, %14 : vector<1x32xf32>
    %16 = math.rsqrt %15 : vector<1x32xf32>
    %17 = vector.broadcast %9 : vector<1x32xf32> to vector<16x32xf32>
    %18 = arith.subf %2, %17 : vector<16x32xf32>
    %19 = vector.broadcast %16 : vector<1x32xf32> to vector<16x32xf32>
    %20 = arith.mulf %18, %19 : vector<16x32xf32>
    %c0_6 = arith.constant 0 : index
    %c0_7 = arith.constant 0 : index
    %21 = vector.load %arg1[%c0_6, %c0_7] : memref<33x4xf32, #tpu.memory_space<vmem>>, vector<33x4xf32>
    %22 = vector.extract_strided_slice %21 {offsets = [0, 0], sizes = [32, 4], strides = [1, 1]} : vector<33x4xf32> to vector<32x4xf32>
    %cst_8 = arith.constant dense<0.000000e+00> : vector<16x4xf32>
    %23 = tpu.matmul %20, %22, %cst_8 {dimension_numbers = #tpu.dot_dimension_numbers<[1], [0], [0], [1], [0, 0, 1, 1], [], []>} : vector<16x32xf32>, vector<32x4xf32>, vector<16x4xf32> -> vector<16x4xf32>
    %24 = vector.extract_strided_slice %21 {offsets = [32, 0], sizes = [1, 4], strides = [1, 1]} : vector<33x4xf32> to vector<1x4xf32>
    %25 = vector.broadcast %24 : vector<1x4xf32> to vector<16x4xf32>
    %26 = arith.addf %23, %25 : vector<16x4xf32>
    %c0_9 = arith.constant 0 : index
    %c0_10 = arith.constant 0 : index
    %27 = vector.load %arg2[%c0_9, %c0_10] : memref<16x4xf32, #tpu.memory_space<vmem>>, vector<16x4xf32>
    tpu.vector_store %arg2[%c0_9, %c0_10], %26 {strides = array<i32>} : memref<16x4xf32, #tpu.memory_space<vmem>>, vector<16x4xf32>,
    return
  }
}

</mosaic_0001>

<bundles_post_ra>
// kernel: age_regressor_forward.1
= control target key start
LH: loop header
LB: loop body
LE: loop exit
PB: predicated region body
PF: predicated region fallthrough
CT: control target
= control target key end

     0   :  { %7 = vsyncpa [#allocation3], 0  ;;  %s418_s9 = smov [#allocation2]   ;;  %s616_s0 = inlined_call_operand.hbm [shape: f32[16,8,32], index: 0, kind: input, shape index: {}]   ;;  %s617_s1 = inlined_call_operand.vmem [shape: f32[33,4], index: 1, kind: input, shape index: {}]   ;;  %s618_s2 = inlined_call_operand.vmem [shape: f32[16,4], index: 2, kind: output, shape index: {}]  }
   0x1   :  { %s13_s10 = sshll.u32 %s418_s9, 4  ;;  %s394_s13 = scalar_lea.hbm %s616_s0, 2048  ;;  %s14_s10 = int_to_ptr.vmem [resolvable:$true] %s13_s10 }
   0x2   :  { %p395_p0 = scmp.ne.s32.totalorder %s616_s0, %s394_s13  ;;  %p398_p1 = scmp.lt.u32.totalorder %s394_s13, %s616_s0 }
   0x4   :  { %p400_p2 = pnand %p398_p1, %p395_p0 }
   0x6   :  { %403 = shalt.err (!%p400_p2)
}
   0x7   :  { %s404_s18 = scalar_lea.vmem %s14_s10, 2048  ;;  %p409_p4 = scmp.lt.s32.totalorder %s14_s10, %s14_s10 }
   0x8   :  { %p405_p3 = scmp.ne.s32.totalorder %s14_s10, %s404_s18  ;;  %p410_p5 = scmp.lt.s32.totalorder %s404_s18, %s404_s18 }
   0xa   :  { %p411_p6 = por %p410_p5, %p409_p4 }
   0xc   :  { %p412_p7 = pnand %p411_p6, %p405_p3 }
   0xe   :  { %415 = shalt.err (!%p412_p7)
}
   0xf   :  { %s419_s19 = smov 128   ;;  %s420_s20 = smov 8  }
  0x10   :  { %19 = dma.hbm_to_vmem [thread:$0]  %s616_s0, 2048, %s14_s10, [#allocation3], %s419_s19, %s419_s19, %s420_s20  }
  0x11   :  { %416 = dma.done.wait [#allocation3], 2048  }
  0x12   :  { %417 = vsyncadd [#allocation3], 4294965248  ;;  %vm58_vm0 = vcmask 1041409   ;;  %v221_v0 = vld [vmem:[%s617_s1] sm:$0xff]  ;;  %v222_v1 = vld [vmem:[%s617_s1 + $0x8] sm:$0xff]  ;;  %vm61_vm1 = vcmask 1042434  }
  0x13   :  { %v223_v2 = vld [vmem:[%s617_s1 + $0x10] sm:$0xff]  ;;  %vm64_vm2 = vcmask 1043459   ;;  %vm67_vm3 = vcmask 1044484   ;;  %v381_v3 = vpack.c.bf16 %v222_v1, %v221_v0  ;;  %v224_v4 = vld [vmem:[%s617_s1 + $0x18] sm:$0xff]  ;;  %v460_v5 = vld [vmem:[#allocation2] sm:$0xff]  ;;  %vm70_vm4 = vcmask 1045509  }
  0x14   :  { %v462_v6 = vld [vmem:[#allocation2 + $0x8] sm:$0xff]  ;;  %vm73_vm5 = vcmask 1046534   ;;  %vm76_vm6 = vcmask 1047559   ;;  %v385_v7 = vpack.c.bf16 %v224_v4, %v223_v2  ;;  %v464_v8 = vld [vmem:[#allocation2 + $0x10] sm:$0xff]  ;;  %v466_v9 = vld [vmem:[#allocation2 + $0x18] sm:$0xff]  ;;  %vm94_vm7 = vcmask 261120  }
  0x15   :  { %v468_v10 = vld [vmem:[#allocation2 + $0x20] sm:$0xff]  ;;  %v57_v11 = vrot.slane %v462_v6, 7  ;;  %v473_v12 = vmul.f32 %v460_v5, %v460_v5  ;;  %382 = vmatprep.subr.bf16.mxu0 %v381_v3  ;;  %v475_v13 = vld [vmem:[#allocation2 + $0x28] sm:$0xff]  ;;  %v477_v14 = vld [vmem:[#allocation2 + $0x30] sm:$0xff]  ;;  %v60_v16 = vrot.slane %v464_v8, 6  ;;  %v63_v17 = vrot.slane %v466_v9, 5 }
  0x16   :  { %v479_v15 = vld [vmem:[#allocation2 + $0x38] sm:$0xff]  ;;  %v66_v18 = vrot.slane %v468_v10, 4  ;;  %v105_v19 = vmul.f32 %v462_v6, %v462_v6  ;;  %384 = vmatpush3.bf16.msra.mxu0 %v381_v3  ;;  %v486_v20 = vld [vmem:[#allocation2 + $0x40] sm:$0xff]  ;;  %v488_v21 = vld [vmem:[#allocation2 + $0x48] sm:$0xff]  ;;  %v69_v24 = vrot.slane %v475_v13, 3  ;;  %v72_v25 = vrot.slane %v477_v14, 2 }
  0x17   :  { %v490_v22 = vld [vmem:[#allocation2 + $0x50] sm:$0xff]  ;;  %v59_v23 = vsel %vm58_vm0, %v57_v11, %v460_v5  ;;  %v106_v26 = vmul.f32 %v464_v8, %v464_v8  ;;  %386 = vmatprep.subr.bf16.mxu0 %v385_v7  ;;  %v498_v27 = vld [vmem:[#allocation2 + $0x58] sm:$0xff]  ;;  %v500_v28 = vld [vmem:[#allocation2 + $0x60] sm:$0xff]  ;;  %v75_v31 = vrot.slane %v479_v15, 1  ;;  %v78_v32 = vrot.slane %v488_v21, 7 }
  0x18   :  { %v502_v29 = vld [vmem:[#allocation2 + $0x68] sm:$0xff]  ;;  %v62_v30 = vsel %vm61_vm1, %v60_v16, %v59_v23  ;;  %v80_v33 = vrot.slane %v490_v22, 6  ;;  %v508_v34 = vld [vmem:[#allocation2 + $0x70] sm:$0xff]  ;;  %v510_v35 = vld [vmem:[#allocation2 + $0x78] sm:$0xff]  ;;  %v82_v37 = vrot.slane %v498_v27, 5  ;;  %v84_v38 = vrot.slane %v500_v28, 4 }
  0x19   :  { %v65_v36 = vsel %vm64_vm2, %v63_v17, %v62_v30  ;;  %v107_v39 = vmul.f32 %v466_v9, %v466_v9  ;;  %v79_v41 = vsel %vm58_vm0, %v78_v32, %v486_v20  ;;  %v86_v42 = vrot.slane %v502_v29, 3 }
  0x1a   :  { %v68_v40 = vsel %vm67_vm3, %v66_v18, %v65_v36  ;;  %v88_v43 = vrot.slane %v508_v34, 2  ;;  %388 = vmatpush3.bf16.msra.mxu0 %v385_v7  ;;  %v81_v45 = vsel %vm61_vm1, %v80_v33, %v79_v41  ;;  %v90_v46 = vrot.slane %v510_v35, 1 }
  0x1b   :  { %v71_v44 = vsel %vm70_vm4, %v69_v24, %v68_v40  ;;  %v108_v47 = vmul.f32 %v468_v10, %v468_v10  ;;  %v83_v49 = vsel %vm64_vm2, %v82_v37, %v81_v45  ;;  %v109_v50 = vmul.f32 %v475_v13, %v475_v13 }
  0x1c   :  { %v74_v48 = vsel %vm73_vm5, %v72_v25, %v71_v44  ;;  %v110_v51 = vmul.f32 %v477_v14, %v477_v14  ;;  %v85_v53 = vsel %vm67_vm3, %v84_v38, %v83_v49  ;;  %v111_v54 = vmul.f32 %v479_v15, %v479_v15 }
  0x1d   :  { %v77_v52 = vsel %vm76_vm6, %v75_v31, %v74_v48  ;;  %v112_v55 = vmul.f32 %v486_v20, %v486_v20  ;;  %v87_v56 = vsel %vm70_vm4, %v86_v42, %v85_v53  ;;  %v113_v58 = vmul.f32 %v488_v21, %v488_v21 }
  0x1e   :  { %v95_v57 = vsel %vm94_vm7, %v77_v52, 0.0  ;;  %v114_v59 = vmul.f32 %v490_v22, %v490_v22  ;;  %v89_v60 = vsel %vm73_vm5, %v88_v43, %v87_v56  ;;  %v115_v61 = vmul.f32 %v498_v27, %v498_v27 }
  0x1f   :  { %v116_v62 = vmul.f32 %v500_v28, %v500_v28  ;;  %v117_v63 = vmul.f32 %v502_v29, %v502_v29  ;;  %v91_v0 = vsel %vm76_vm6, %v90_v46, %v89_v60  ;;  %v118_v1 = vmul.f32 %v508_v34, %v508_v34 }
  0x20   :  { %v136_v2 = vrot.slane %v105_v19, 7  ;;  %v138_v3 = vrot.slane %v106_v26, 6  ;;  %v96_v4 = vsel %vm94_vm7, %v91_v0, 0.0  ;;  %v119_v7 = vmul.f32 %v510_v35, %v510_v35 }
  0x21   :  { %v140_v11 = vrot.slane %v107_v39, 5  ;;  %v142_v16 = vrot.slane %v108_v47, 4  ;;  %v97_v17 = vadd.f32 %v96_v4, %v95_v57  ;;  %v144_v23 = vrot.slane %v109_v50, 3 }
  0x22   :  { %v137_v18 = vsel %vm58_vm0, %v136_v2, %v473_v12  ;;  %v146_v24 = vrot.slane %v110_v51, 2  ;;  %v150_v30 = vrot.slane %v113_v58, 7  ;;  %v152_v31 = vrot.slane %v114_v59, 6 }
  0x23   :  { %v139_v25 = vsel %vm61_vm1, %v138_v3, %v137_v18  ;;  %v154_v32 = vrot.slane %v115_v61, 5  ;;  %v98_v19 = vrot.slane %v97_v17, 4  ;;  %v148_v33 = vrot.slane %v111_v54, 1 }
  0x24   :  { %v141_v26 = vsel %vm64_vm2, %v140_v11, %v139_v25  ;;  %v156_v36 = vrot.slane %v116_v62, 4  ;;  %v151_v38 = vsel %vm58_vm0, %v150_v30, %v112_v55  ;;  %v158_v39 = vrot.slane %v117_v63, 3 }
  0x25   :  { %v143_v37 = vsel %vm67_vm3, %v142_v16, %v141_v26  ;;  %v99_v40 = vadd.f32 %v98_v19, %v97_v17  ;;  %v153_v41 = vsel %vm61_vm1, %v152_v31, %v151_v38  ;;  %v160_v42 = vrot.slane %v118_v1, 2 }
  0x26   :  { %v145_v12 = vsel %vm70_vm4, %v144_v23, %v143_v37  ;;  %v155_v44 = vsel %vm64_vm2, %v154_v32, %v153_v41  ;;  %v162_v45 = vrot.slane %v119_v7, 1  ;;  %v181_v2 = vlaneseq }
  0x27   :  { %v147_v43 = vsel %vm73_vm5, %v146_v24, %v145_v12  ;;  %v100_v46 = vrot.slane %v99_v40, 2  ;;  %v157_v48 = vsel %vm67_vm3, %v156_v36, %v155_v44  ;;  %vm353_vm8 = vcmask 31744  }
  0x28   :  { %v149_v47 = vsel %vm76_vm6, %v148_v33, %v147_v43  ;;  %v159_v49 = vsel %vm70_vm4, %v158_v39, %v157_v48  ;;  %v182_v7 = vshrl.u32 %v181_v2, 7 }
  0x29   :  { %v101_v50 = vadd.f32 %v100_v46, %v99_v40  ;;  %v161_v51 = vsel %vm73_vm5, %v160_v42, %v159_v49  ;;  %v166_v52 = vsel %vm94_vm7, %v149_v47, 0.0 }
  0x2a   :  { %v163_v53 = vsel %vm76_vm6, %v162_v45, %v161_v51  ;;  %v183_v16 = vsub.s32 0, %v182_v7 }
  0x2b   :  { %v167_v54 = vsel %vm94_vm7, %v163_v53, 0.0  ;;  %v102_v55 = vrot.slane %v101_v50, 1 }
  0x2c   :  { %v168_v56 = vadd.f32 %v167_v54, %v166_v52 }
  0x2d   :  { %v103_v58 = vadd.f32 %v102_v55, %v101_v50 }
  0x2e   :  { %v169_v57 = vrot.slane %v168_v56, 4 }
  0x2f   :  { %v175_v62 = vmul.f32 0.0625, %v103_v58 }
  0x30   :  { %v170_v59 = vadd.f32 %v169_v57, %v168_v56 }
  0x31   :  { %v177_v1 = vmul.f32 %v175_v62, %v175_v62  ;;  %v184_v17 = vrot.slane %v175_v62, %v183_v16 }
  0x32   :  { %v171_v60 = vrot.slane %v170_v59, 2 }
  0x33   :  { %v185_v18 = vsub.f32 %v460_v5, %v184_v17  ;;  %v186_v23 = vsub.f32 %v462_v6, %v184_v17  ;;  %v187_v24 = vsub.f32 %v464_v8, %v184_v17  ;;  %v188_v25 = vsub.f32 %v466_v9, %v184_v17 }
  0x34   :  { %v172_v61 = vadd.f32 %v171_v60, %v170_v59  ;;  %v189_v30 = vsub.f32 %v468_v10, %v184_v17  ;;  %v190_v32 = vsub.f32 %v475_v13, %v184_v17  ;;  %v191_v19 = vsub.f32 %v477_v14, %v184_v17 }
  0x35   :  { %v192_v26 = vsub.f32 %v479_v15, %v184_v17  ;;  %v193_v33 = vsub.f32 %v486_v20, %v184_v17  ;;  %v194_v5 = vsub.f32 %v488_v21, %v184_v17  ;;  %v195_v6 = vsub.f32 %v490_v22, %v184_v17 }
  0x36   :  { %v173_v63 = vrot.slane %v172_v61, 1  ;;  %v196_v8 = vsub.f32 %v498_v27, %v184_v17  ;;  %v197_v9 = vsub.f32 %v500_v28, %v184_v17  ;;  %v198_v10 = vsub.f32 %v502_v29, %v184_v17 }
  0x37   :  { %v199_v37 = vsub.f32 %v508_v34, %v184_v17  ;;  %v200_v13 = vsub.f32 %v510_v35, %v184_v17 }
  0x38   :  { %v174_v0 = vadd.f32 %v173_v63, %v172_v61 }
  0x3a   :  { %v176_v3 = vmul.f32 0.0625, %v174_v0 }
  0x3c   :  { %v178_v4 = vsub.f32 %v176_v3, %v177_v1 }
  0x3e   :  { %v179_v11 = vadd.f32 1e-05, %v178_v4 }
  0x40   :  { %392 = vrsqrt.f32 %v179_v11 }
  0x4a   :  { %v393_v31 = vpop.eup %392 }
  0x4b   :  { %v204_v36 = vrot.slane %v393_v31, %v183_v16  ;;  %v361_v16 = vld [vmem:[%s617_s1 + $0x20] ss:$0 sm:$0xff] }
  0x4d   :  { %v205_v14 = vmul.f32 %v204_v36, %v185_v18  ;;  %v206_v38 = vmul.f32 %v204_v36, %v186_v23  ;;  %v207_v15 = vmul.f32 %v204_v36, %v187_v24  ;;  %v208_v39 = vmul.f32 %v204_v36, %v188_v25 }
  0x4e   :  { %v209_v20 = vmul.f32 %v204_v36, %v189_v30  ;;  %v210_v40 = vmul.f32 %v204_v36, %v190_v32  ;;  %v211_v12 = vmul.f32 %v204_v36, %v191_v19  ;;  %v212_v21 = vmul.f32 %v204_v36, %v192_v26 }
  0x4f   :  { %v246_v41 = vrot.slane %v206_v38, 7  ;;  %v248_v22 = vrot.slane %v207_v15, 6  ;;  %v250_v42 = vrot.slane %v208_v39, 5  ;;  %v213_v27 = vmul.f32 %v204_v36, %v193_v33 }
  0x50   :  { %v252_v43 = vrot.slane %v209_v20, 4  ;;  %v254_v28 = vrot.slane %v210_v40, 3  ;;  %v256_v44 = vrot.slane %v211_v12, 2  ;;  %v258_v29 = vrot.slane %v212_v21, 1 }
  0x51   :  { %v247_v34 = vsel %vm58_vm0, %v246_v41, %v205_v14  ;;  %v214_v45 = vmul.f32 %v204_v36, %v194_v5  ;;  %v215_v35 = vmul.f32 %v204_v36, %v195_v6  ;;  %v216_v46 = vmul.f32 %v204_v36, %v196_v8 }
  0x52   :  { %v249_v47 = vsel %vm61_vm1, %v248_v22, %v247_v34  ;;  %v217_v48 = vmul.f32 %v204_v36, %v197_v9  ;;  %v218_v49 = vmul.f32 %v204_v36, %v198_v10  ;;  %v219_v50 = vmul.f32 %v204_v36, %v199_v37 }
  0x53   :  { %v251_v51 = vsel %vm64_vm2, %v250_v42, %v249_v47  ;;  %v220_v52 = vmul.f32 %v204_v36, %v200_v13  ;;  %v260_v53 = vrot.slane %v214_v45, 7  ;;  %v262_v54 = vrot.slane %v215_v35, 6 }
  0x54   :  { %v253_v55 = vsel %vm67_vm3, %v252_v43, %v251_v51  ;;  %v264_v56 = vrot.slane %v216_v46, 5  ;;  %v266_v57 = vrot.slane %v217_v48, 4  ;;  %v268_v60 = vrot.slane %v218_v49, 3 }
  0x55   :  { %v255_v58 = vsel %vm70_vm4, %v254_v28, %v253_v55  ;;  %v261_v59 = vsel %vm58_vm0, %v260_v53, %v213_v27  ;;  %v270_v63 = vrot.slane %v219_v50, 2  ;;  %v272_v2 = vrot.slane %v220_v52, 1 }
  0x56   :  { %v257_v61 = vsel %vm73_vm5, %v256_v44, %v255_v58  ;;  %v263_v62 = vsel %vm61_vm1, %v262_v54, %v261_v59 }
  0x57   :  { %v259_v0 = vsel %vm76_vm6, %v258_v29, %v257_v61  ;;  %v265_v1 = vsel %vm64_vm2, %v264_v56, %v263_v62 }
  0x58   :  { %378 = vmatprep.mubr.msk.f32.mxu0 %vm94_vm7, %v259_v0  ;;  %v267_v3 = vsel %vm67_vm3, %v266_v57, %v265_v1 }
  0x59   :  { %v269_v4 = vsel %vm70_vm4, %v268_v60, %v267_v3 }
  0x5a   :  { %v271_v7 = vsel %vm73_vm5, %v270_v63, %v269_v4 }
  0x5b   :  { %v273_v11 = vsel %vm76_vm6, %v272_v2, %v271_v7 }
  0x5c   :  { %379 = vmatmul.mubr.msk.f32.vlgmr.msra.gmra.mrb[0].mxu0 %vm94_vm7, %v273_v11 }
 0x12f   :  { %v380_v17 = vpop.f32.mrb[0].mxu0 }
 0x130   :  { %v350_v18 = vadd.f32 %v380_v17, %v361_v16  ;;  %v344_v23 = vpop.f32.mrb[1].mxu0 }
 0x131   :  { %v345_v24 = vadd.f32 %v361_v16, %v344_v23 }
 0x132   :  { %355 = vst.msk [vmem:[%s618_s2 + $0x8] sm:$0xff] %vm353_vm8, %v350_v18 }
 0x133   :  { %354 = vst.msk [vmem:[%s618_s2] sm:$0xff] %vm353_vm8, %v345_v24 }
 0x134   :  { %360 = vsyncpa [#allocation3], 1 }

</bundles_post_ra>
